<compile_context>
chip_gen: v6e
topology: v6e:2x2x1
jax: 0.10.0
libtpu: 0.0.40
codegen_flags: <defaults>
</compile_context>

<pallas_src>
import functools

import jax
import jax.numpy as jnp
from jax import lax
from jax.experimental import pallas as pl
from jax.experimental.pallas import tpu as pltpu


# ----------------------------------------------------------------------------
# Kernel 1: fused Q/K/V projection, head-split bf16 output, q pre-scaled
# ----------------------------------------------------------------------------
def qkv_proj_kernel(x_ref, w_ref, b_ref, q_ref, k_ref, v_ref, *,
                    num_heads, head_dim):
    # x_ref: (1, tm, H) activations; w_ref: (H, 3H) bf16 (resident across grid);
    # b_ref: (1, 3H) f32; q/k/v_ref: (1, nH, tm, d) bf16 output blocks.
    x = x_ref[0].astype(jnp.bfloat16)
    y = jnp.dot(x, w_ref[...], preferred_element_type=jnp.float32)   # (tm, 3H)
    y = y + b_ref[...]
    hidden = num_heads * head_dim
    inv_sqrt_d = jnp.float32(1.0 / (head_dim ** 0.5))
    # Scatter per-head slices (static unrolled loop; no transposes, no HBM
    # round trip between projection and attention).
    for h in range(num_heads):
        lo = h * head_dim
        hi = lo + head_dim
        q_ref[0, h] = (y[:, lo:hi] * inv_sqrt_d).astype(q_ref.dtype)
        k_ref[0, h] = y[:, hidden + lo:hidden + hi].astype(k_ref.dtype)
        v_ref[0, h] = y[:, 2 * hidden + lo:2 * hidden + hi].astype(v_ref.dtype)


# ----------------------------------------------------------------------------
# Kernel 2: flash-style causal attention, online softmax, hb heads per step
# ----------------------------------------------------------------------------
def flash_attention_kernel(q_ref, k_ref, v_ref, mask_ref, o_ref,
                           m_sc, l_sc, acc_sc):
    qi = pl.program_id(2)
    ki = pl.program_id(3)
    nk = pl.num_programs(3)
    tq = q_ref.shape[2]
    tk = k_ref.shape[2]

    q_start = qi * tq
    k_start = ki * tk
    q_end = q_start + (tq - 1)
    k_end = k_start + (tk - 1)

    @pl.when(ki == 0)
    def _init():
        m_sc[...] = jnp.full(m_sc.shape, -jnp.inf, dtype=jnp.float32)
        l_sc[...] = jnp.zeros(l_sc.shape, dtype=jnp.float32)
        acc_sc[...] = jnp.zeros(acc_sc.shape, dtype=jnp.float32)

    def scores():
        # q was pre-scaled by 1/sqrt(d) in the projection kernel; contract on
        # the head dim directly for all hb heads at once (batched MXU matmul).
        s = jnp.einsum("hqd,hkd->hqk", q_ref[0], k_ref[0],
                       preferred_element_type=jnp.float32)      # (hb, tq, tk)
        return s + mask_ref[0, 0]          # additive padding mask, (1, tk)

    def accumulate(s):
        m_prev = m_sc[...]
        m_new = jnp.maximum(m_prev, jnp.max(s, axis=-1, keepdims=True))
        alpha = jnp.exp(m_prev - m_new)
        p = jnp.exp(s - m_new)
        l_sc[...] = alpha * l_sc[...] + jnp.sum(p, axis=-1, keepdims=True)
        acc_sc[...] = alpha * acc_sc[...] + jnp.einsum(
            "hqk,hkd->hqd", p.astype(jnp.bfloat16), v_ref[0],
            preferred_element_type=jnp.float32)
        m_sc[...] = m_new

    # kv block strictly below the causal diagonal: no mask work at all.
    @pl.when(k_end <= q_start)
    def _below_diag():
        accumulate(scores())

    # kv block straddling the diagonal: build the triangular -10000 mask
    # (matches the PyTorch module's additive causal mask) for this block only;
    # the same (tq, tk) mask is shared by all hb heads in the block.
    @pl.when(jnp.logical_and(k_end > q_start, k_start <= q_end))
    def _on_diag():
        s = scores()
        row = q_start + lax.broadcasted_iota(jnp.int32, (tq, tk), 0)
        col = k_start + lax.broadcasted_iota(jnp.int32, (tq, tk), 1)
        s = s + jnp.where(col > row, jnp.float32(-10000.0), jnp.float32(0.0))
        accumulate(s)

    # kv blocks strictly above the diagonal (k_start > q_end) are skipped.

    @pl.when(ki == nk - 1)
    def _finalize():
        o_ref[0] = (acc_sc[...] *
                    pl.reciprocal(l_sc[...], approx=True)).astype(o_ref.dtype)


# ----------------------------------------------------------------------------
# Wrapper
# ----------------------------------------------------------------------------
def causal_self_attention(hidden_states, attention_mask, params, num_heads,
                          *, block_m=128, block_q=128, block_k=128,
                          block_h=8):
    B, T, H = hidden_states.shape
    d = H // num_heads
    assert num_heads * d == H

    tm = min(block_m, T)
    tq = min(block_q, T)
    tk = min(block_k, T)
    assert T % tm == 0 and T % tq == 0 and T % tk == 0, \
        "seq_len must be divisible by the block sizes"
    # TODO(synk): pad T up to a block multiple for ragged sequence lengths.

    # Largest divisor of num_heads not exceeding block_h -> heads per step.
    hb = 1
    for cand in range(min(num_heads, block_h), 0, -1):
        if num_heads % cand == 0:
            hb = cand
            break

    # One-time weight prep (loop-invariant): pre-transpose the PyTorch [out,in]
    # Linear weights and fuse q/k/v into a single [H, 3H] bf16 matrix.
    w_qkv = jnp.concatenate(
        [params["wq"].T, params["wk"].T, params["wv"].T], axis=1
    ).astype(jnp.bfloat16)                                        # [H, 3H]
    b_qkv = jnp.concatenate(
        [params["bq"], params["bk"], params["bv"]]
    )[None, :].astype(jnp.float32)                                # [1, 3H]

    proj_kernel = functools.partial(
        qkv_proj_kernel, num_heads=num_heads, head_dim=d)
    qkv_shape = jax.ShapeDtypeStruct((B, num_heads, T, d), jnp.bfloat16)
    head_out_spec = pl.BlockSpec((1, num_heads, tm, d),
                                 lambda b, i: (b, 0, i, 0))

    q, k, v = pl.pallas_call(
        proj_kernel,
        out_shape=(qkv_shape, qkv_shape, qkv_shape),
        grid=(B, T // tm),
        in_specs=[
            pl.BlockSpec((1, tm, H), lambda b, i: (b, i, 0)),
            pl.BlockSpec((H, 3 * H), lambda b, i: (0, 0)),   # weight resident
            pl.BlockSpec((1, 3 * H), lambda b, i: (0, 0)),
        ],
        out_specs=(head_out_spec, head_out_spec, head_out_spec),
        compiler_params=pltpu.CompilerParams(
            dimension_semantics=("parallel", "parallel"),
            vmem_limit_bytes=48 * 1024 * 1024),
    )(hidden_states, w_qkv, b_qkv)

    # --- flash attention: grid (B, head-blocks, q-blocks, kv-blocks) ---------
    nq, nk = T // tq, T // tk
    nhb = num_heads // hb

    def q_index(b, h, qi, ki):
        return (b, h, qi, 0)

    def kv_index(b, h, qi, ki):
        # Clamp above-diagonal (skipped) steps to the last needed kv block so
        # the block index is unchanged and no DMA is issued for them.
        kv_last = (qi * tq + tq - 1) // tk
        return (b, h, jnp.minimum(ki, kv_last), 0)

    def mask_index(b, h, qi, ki):
        kv_last = (qi * tq + tq - 1) // tk
        return (b, 0, 0, jnp.minimum(ki, kv_last))

    # NOTE: output kept as [B, nH, T, d] to match the PyTorch forward's return
    # value; if a consumer merges heads, a lane-dense [B, T, H] out_spec is the
    # better layout.
    attn_out = pl.pallas_call(
        flash_attention_kernel,
        out_shape=jax.ShapeDtypeStruct((B, num_heads, T, d), jnp.float32),
        grid=(B, nhb, nq, nk),
        in_specs=[
            pl.BlockSpec((1, hb, tq, d), q_index),
            pl.BlockSpec((1, hb, tk, d), kv_index),
            pl.BlockSpec((1, hb, tk, d), kv_index),
            pl.BlockSpec((1, 1, 1, tk), mask_index),
        ],
        out_specs=pl.BlockSpec((1, hb, tq, d), q_index),
        scratch_shapes=[
            pltpu.VMEM((hb, tq, 1), jnp.float32),   # running row max  m
            pltpu.VMEM((hb, tq, 1), jnp.float32),   # running denom    l
            pltpu.VMEM((hb, tq, d), jnp.float32),   # output accumulator
        ],
        compiler_params=pltpu.CompilerParams(
            dimension_semantics=("parallel", "parallel", "parallel",
                                 "arbitrary"),
            vmem_limit_bytes=48 * 1024 * 1024),
    )(q, k, v, attention_mask.astype(jnp.float32))

    return attn_out  # [B, num_heads, T, head_dim] (matches PyTorch forward)


# ----------------------------------------------------------------------------
# Pure-JAX reference (mirrors the PyTorch code) for a correctness check
# ----------------------------------------------------------------------------
def reference(hidden_states, attention_mask, params, num_heads):
    B, T, H = hidden_states.shape
    d = H // num_heads

    def lin(x, w, b):
        return x @ w.T + b

    def split_heads(x):
        return jnp.transpose(x.reshape(B, T, num_heads, d), (0, 2, 1, 3))

    q = split_heads(lin(hidden_states, params["wq"], params["bq"]))
    k = split_heads(lin(hidden_states, params["wk"], params["bk"]))
    v = split_heads(lin(hidden_states, params["wv"], params["bv"]))

    causal = jnp.triu(jnp.ones((T, T), jnp.float32), k=1) * -10000.0
    scores = jnp.einsum("bhqd,bhkd->bhqk", q, k) / (d ** 0.5)
    scores = scores + causal[None, None] + attention_mask
    probs = jax.nn.softmax(scores.astype(jnp.float32), axis=-1)
    return jnp.einsum("bhqk,bhkd->bhqd", probs, v)


if __name__ == "__main__":
    B, T, H, NUM_HEADS = 2, 8, 32, 4

    key = jax.random.PRNGKey(0)
    kq, kk, kv, kbq, kbk, kbv, kx = jax.random.split(key, 7)

    params = {
        "wq": jax.random.normal(kq, (H, H), jnp.float32) * 0.02,
        "wk": jax.random.normal(kk, (H, H), jnp.float32) * 0.02,
        "wv": jax.random.normal(kv, (H, H), jnp.float32) * 0.02,
        "bq": jax.random.normal(kbq, (H,), jnp.float32) * 0.02,
        "bk": jax.random.normal(kbk, (H,), jnp.float32) * 0.02,
        "bv": jax.random.normal(kbv, (H,), jnp.float32) * 0.02,
    }

    hidden_states = jax.random.normal(kx, (B, T, H), jnp.float32)

    # additive attention mask [B, 1, 1, T]: last 2 positions of batch 1 padded
    pos = jnp.arange(T)
    valid_len = jnp.array([T, T - 2])
    attention_mask = jnp.where(pos[None, :] < valid_len[:, None], 0.0, -10000.0)
    attention_mask = attention_mask[:, None, None, :].astype(jnp.float32)

    out = causal_self_attention(hidden_states, attention_mask, params,
                                NUM_HEADS)
    out = jax.block_until_ready(out)

    ref = reference(hidden_states, attention_mask, params, NUM_HEADS)
    assert out.shape == (B, NUM_HEADS, T, H // NUM_HEADS), out.shape
    # bf16 MXU inputs (f32 accumulation) + approx reciprocal -> relaxed tol
    # vs the pure-f32 reference.
    assert jnp.allclose(out, ref, atol=2e-2, rtol=2e-2), (
        "mismatch vs reference; max abs err = "
        f"{float(jnp.max(jnp.abs(out - ref)))}")

    print("KERNEL_OK")
</pallas_src>

<mosaic_0001>
module attributes {stable_mosaic.version = 11 : i64} {
  func.func @qkv_proj_kernel(%arg0: i32, %arg1: i32, %arg2: memref<1x8x32xf32, #tpu.memory_space<vmem>>, %arg3: memref<32x96xbf16, #tpu.memory_space<vmem>>, %arg4: memref<1x96xf32, #tpu.memory_space<vmem>>, %arg5: memref<1x4x8x8xbf16, #tpu.memory_space<vmem>>, %arg6: memref<1x4x8x8xbf16, #tpu.memory_space<vmem>>, %arg7: memref<1x4x8x8xbf16, #tpu.memory_space<vmem>>) attributes {dimension_semantics = [#tpu.dimension_semantics<parallel>, #tpu.dimension_semantics<parallel>], iteration_bounds = array<i64: 2, 1>, scalar_prefetch = 0 : i64, scratch_operands = 0 : i64, tpu.core_type = #tpu.core_type<tc>, window_params = [{transform_indices = @transform_0, window_bounds = array<i64: 1, 8, 32>}, {pipeline_mode = #tpu.pipeline_mode<synchronous>, transform_indices = @transform_1, window_bounds = array<i64: 32, 96>}, {pipeline_mode = #tpu.pipeline_mode<synchronous>, transform_indices = @transform_2, window_bounds = array<i64: 1, 96>}, {transform_indices = @transform_3, window_bounds = array<i64: 1, 4, 8, 8>}, {transform_indices = @transform_4, window_bounds = array<i64: 1, 4, 8, 8>}, {transform_indices = @transform_5, window_bounds = array<i64: 1, 4, 8, 8>}]} {
    %c0 = arith.constant 0 : index
    %c0_0 = arith.constant 0 : index
    %c0_1 = arith.constant 0 : index
    %0 = vector.load %arg2[%c0, %c0_0, %c0_1] : memref<1x8x32xf32, #tpu.memory_space<vmem>>, vector<1x8x32xf32>
    %1 = vector.shape_cast %0 : vector<1x8x32xf32> to vector<8x32xf32>
    %2 = arith.truncf %1 : vector<8x32xf32> to vector<8x32xbf16>
    %c0_2 = arith.constant 0 : index
    %c0_3 = arith.constant 0 : index
    %3 = vector.load %arg3[%c0_2, %c0_3] : memref<32x96xbf16, #tpu.memory_space<vmem>>, vector<32x96xbf16>
    %cst = arith.constant dense<0.000000e+00> : vector<8x96xf32>
    %4 = tpu.matmul %2, %3, %cst {dimension_numbers = #tpu.dot_dimension_numbers<[1], [0], [0], [1], [0, 0, 1, 1], [], []>} : vector<8x32xbf16>, vector<32x96xbf16>, vector<8x96xf32> -> vector<8x96xf32>
    %c0_4 = arith.constant 0 : index
    %c0_5 = arith.constant 0 : index
    %5 = vector.load %arg4[%c0_4, %c0_5] : memref<1x96xf32, #tpu.memory_space<vmem>>, vector<1x96xf32>
    %6 = vector.broadcast %5 : vector<1x96xf32> to vector<8x96xf32>
    %7 = arith.addf %4, %6 : vector<8x96xf32>
    %8 = vector.extract_strided_slice %7 {offsets = [0, 0], sizes = [8, 8], strides = [1, 1]} : vector<8x96xf32> to vector<8x8xf32>
    %cst_6 = arith.constant 0.353553385 : f32
    %9 = vector.broadcast %cst_6 : f32 to vector<8x8xf32>
    %10 = arith.mulf %8, %9 : vector<8x8xf32>
    %11 = arith.truncf %10 : vector<8x8xf32> to vector<8x8xbf16>
    %c0_7 = arith.constant 0 : index
    %c0_8 = arith.constant 0 : index
    %c0_9 = arith.constant 0 : index
    %c0_10 = arith.constant 0 : index
    %12 = vector.load %arg5[%c0_7, %c0_8, %c0_9, %c0_10] : memref<1x4x8x8xbf16, #tpu.memory_space<vmem>>, vector<1x1x8x8xbf16>
    %13 = vector.shape_cast %12 : vector<1x1x8x8xbf16> to vector<8x8xbf16>
    %14 = vector.shape_cast %11 : vector<8x8xbf16> to vector<1x1x8x8xbf16>
    tpu.vector_store %arg5[%c0_7, %c0_8, %c0_9, %c0_10], %14 {strides = array<i32>} : memref<1x4x8x8xbf16, #tpu.memory_space<vmem>>, vector<1x1x8x8xbf16>,
    %15 = vector.extract_strided_slice %7 {offsets = [0, 32], sizes = [8, 8], strides = [1, 1]} : vector<8x96xf32> to vector<8x8xf32>
    %16 = arith.truncf %15 : vector<8x8xf32> to vector<8x8xbf16>
    %c0_11 = arith.constant 0 : index
    %c0_12 = arith.constant 0 : index
    %c0_13 = arith.constant 0 : index
    %c0_14 = arith.constant 0 : index
    %17 = vector.load %arg6[%c0_11, %c0_12, %c0_13, %c0_14] : memref<1x4x8x8xbf16, #tpu.memory_space<vmem>>, vector<1x1x8x8xbf16>
    %18 = vector.shape_cast %17 : vector<1x1x8x8xbf16> to vector<8x8xbf16>
    %19 = vector.shape_cast %16 : vector<8x8xbf16> to vector<1x1x8x8xbf16>
    tpu.vector_store %arg6[%c0_11, %c0_12, %c0_13, %c0_14], %19 {strides = array<i32>} : memref<1x4x8x8xbf16, #tpu.memory_space<vmem>>, vector<1x1x8x8xbf16>,
    %20 = vector.extract_strided_slice %7 {offsets = [0, 64], sizes = [8, 8], strides = [1, 1]} : vector<8x96xf32> to vector<8x8xf32>
    %21 = arith.truncf %20 : vector<8x8xf32> to vector<8x8xbf16>
    %c0_15 = arith.constant 0 : index
    %c0_16 = arith.constant 0 : index
    %c0_17 = arith.constant 0 : index
    %c0_18 = arith.constant 0 : index
    %22 = vector.load %arg7[%c0_15, %c0_16, %c0_17, %c0_18] : memref<1x4x8x8xbf16, #tpu.memory_space<vmem>>, vector<1x1x8x8xbf16>
    %23 = vector.shape_cast %22 : vector<1x1x8x8xbf16> to vector<8x8xbf16>
    %24 = vector.shape_cast %21 : vector<8x8xbf16> to vector<1x1x8x8xbf16>
    tpu.vector_store %arg7[%c0_15, %c0_16, %c0_17, %c0_18], %24 {strides = array<i32>} : memref<1x4x8x8xbf16, #tpu.memory_space<vmem>>, vector<1x1x8x8xbf16>,
    %25 = vector.extract_strided_slice %7 {offsets = [0, 8], sizes = [8, 8], strides = [1, 1]} : vector<8x96xf32> to vector<8x8xf32>
    %cst_19 = arith.constant 0.353553385 : f32
    %26 = vector.broadcast %cst_19 : f32 to vector<8x8xf32>
    %27 = arith.mulf %25, %26 : vector<8x8xf32>
    %28 = arith.truncf %27 : vector<8x8xf32> to vector<8x8xbf16>
    %c0_20 = arith.constant 0 : index
    %c1 = arith.constant 1 : index
    %c0_21 = arith.constant 0 : index
    %c0_22 = arith.constant 0 : index
    %29 = vector.load %arg5[%c0_20, %c1, %c0_21, %c0_22] : memref<1x4x8x8xbf16, #tpu.memory_space<vmem>>, vector<1x1x8x8xbf16>
    %30 = vector.shape_cast %29 : vector<1x1x8x8xbf16> to vector<8x8xbf16>
    %31 = vector.shape_cast %28 : vector<8x8xbf16> to vector<1x1x8x8xbf16>
    tpu.vector_store %arg5[%c0_20, %c1, %c0_21, %c0_22], %31 {strides = array<i32>} : memref<1x4x8x8xbf16, #tpu.memory_space<vmem>>, vector<1x1x8x8xbf16>,
    %32 = vector.extract_strided_slice %7 {offsets = [0, 40], sizes = [8, 8], strides = [1, 1]} : vector<8x96xf32> to vector<8x8xf32>
    %33 = arith.truncf %32 : vector<8x8xf32> to vector<8x8xbf16>
    %c0_23 = arith.constant 0 : index
    %c1_24 = arith.constant 1 : index
    %c0_25 = arith.constant 0 : index
    %c0_26 = arith.constant 0 : index
    %34 = vector.load %arg6[%c0_23, %c1_24, %c0_25, %c0_26] : memref<1x4x8x8xbf16, #tpu.memory_space<vmem>>, vector<1x1x8x8xbf16>
    %35 = vector.shape_cast %34 : vector<1x1x8x8xbf16> to vector<8x8xbf16>
    %36 = vector.shape_cast %33 : vector<8x8xbf16> to vector<1x1x8x8xbf16>
    tpu.vector_store %arg6[%c0_23, %c1_24, %c0_25, %c0_26], %36 {strides = array<i32>} : memref<1x4x8x8xbf16, #tpu.memory_space<vmem>>, vector<1x1x8x8xbf16>,
    %37 = vector.extract_strided_slice %7 {offsets = [0, 72], sizes = [8, 8], strides = [1, 1]} : vector<8x96xf32> to vector<8x8xf32>
    %38 = arith.truncf %37 : vector<8x8xf32> to vector<8x8xbf16>
    %c0_27 = arith.constant 0 : index
    %c1_28 = arith.constant 1 : index
    %c0_29 = arith.constant 0 : index
    %c0_30 = arith.constant 0 : index
    %39 = vector.load %arg7[%c0_27, %c1_28, %c0_29, %c0_30] : memref<1x4x8x8xbf16, #tpu.memory_space<vmem>>, vector<1x1x8x8xbf16>
    %40 = vector.shape_cast %39 : vector<1x1x8x8xbf16> to vector<8x8xbf16>
    %41 = vector.shape_cast %38 : vector<8x8xbf16> to vector<1x1x8x8xbf16>
    tpu.vector_store %arg7[%c0_27, %c1_28, %c0_29, %c0_30], %41 {strides = array<i32>} : memref<1x4x8x8xbf16, #tpu.memory_space<vmem>>, vector<1x1x8x8xbf16>,
    %42 = vector.extract_strided_slice %7 {offsets = [0, 16], sizes = [8, 8], strides = [1, 1]} : vector<8x96xf32> to vector<8x8xf32>
    %cst_31 = arith.constant 0.353553385 : f32
    %43 = vector.broadcast %cst_31 : f32 to vector<8x8xf32>
    %44 = arith.mulf %42, %43 : vector<8x8xf32>
    %45 = arith.truncf %44 : vector<8x8xf32> to vector<8x8xbf16>
    %c0_32 = arith.constant 0 : index
    %c2 = arith.constant 2 : index
    %c0_33 = arith.constant 0 : index
    %c0_34 = arith.constant 0 : index
    %46 = vector.load %arg5[%c0_32, %c2, %c0_33, %c0_34] : memref<1x4x8x8xbf16, #tpu.memory_space<vmem>>, vector<1x1x8x8xbf16>
    %47 = vector.shape_cast %46 : vector<1x1x8x8xbf16> to vector<8x8xbf16>
    %48 = vector.shape_cast %45 : vector<8x8xbf16> to vector<1x1x8x8xbf16>
    tpu.vector_store %arg5[%c0_32, %c2, %c0_33, %c0_34], %48 {strides = array<i32>} : memref<1x4x8x8xbf16, #tpu.memory_space<vmem>>, vector<1x1x8x8xbf16>,
    %49 = vector.extract_strided_slice %7 {offsets = [0, 48], sizes = [8, 8], strides = [1, 1]} : vector<8x96xf32> to vector<8x8xf32>
    %50 = arith.truncf %49 : vector<8x8xf32> to vector<8x8xbf16>
    %c0_35 = arith.constant 0 : index
    %c2_36 = arith.constant 2 : index
    %c0_37 = arith.constant 0 : index
    %c0_38 = arith.constant 0 : index
    %51 = vector.load %arg6[%c0_35, %c2_36, %c0_37, %c0_38] : memref<1x4x8x8xbf16, #tpu.memory_space<vmem>>, vector<1x1x8x8xbf16>
    %52 = vector.shape_cast %51 : vector<1x1x8x8xbf16> to vector<8x8xbf16>
    %53 = vector.shape_cast %50 : vector<8x8xbf16> to vector<1x1x8x8xbf16>
    tpu.vector_store %arg6[%c0_35, %c2_36, %c0_37, %c0_38], %53 {strides = array<i32>} : memref<1x4x8x8xbf16, #tpu.memory_space<vmem>>, vector<1x1x8x8xbf16>,
    %54 = vector.extract_strided_slice %7 {offsets = [0, 80], sizes = [8, 8], strides = [1, 1]} : vector<8x96xf32> to vector<8x8xf32>
    %55 = arith.truncf %54 : vector<8x8xf32> to vector<8x8xbf16>
    %c0_39 = arith.constant 0 : index
    %c2_40 = arith.constant 2 : index
    %c0_41 = arith.constant 0 : index
    %c0_42 = arith.constant 0 : index
    %56 = vector.load %arg7[%c0_39, %c2_40, %c0_41, %c0_42] : memref<1x4x8x8xbf16, #tpu.memory_space<vmem>>, vector<1x1x8x8xbf16>
    %57 = vector.shape_cast %56 : vector<1x1x8x8xbf16> to vector<8x8xbf16>
    %58 = vector.shape_cast %55 : vector<8x8xbf16> to vector<1x1x8x8xbf16>
    tpu.vector_store %arg7[%c0_39, %c2_40, %c0_41, %c0_42], %58 {strides = array<i32>} : memref<1x4x8x8xbf16, #tpu.memory_space<vmem>>, vector<1x1x8x8xbf16>,
    %59 = vector.extract_strided_slice %7 {offsets = [0, 24], sizes = [8, 8], strides = [1, 1]} : vector<8x96xf32> to vector<8x8xf32>
    %cst_43 = arith.constant 0.353553385 : f32
    %60 = vector.broadcast %cst_43 : f32 to vector<8x8xf32>
    %61 = arith.mulf %59, %60 : vector<8x8xf32>
    %62 = arith.truncf %61 : vector<8x8xf32> to vector<8x8xbf16>
    %c0_44 = arith.constant 0 : index
    %c3 = arith.constant 3 : index
    %c0_45 = arith.constant 0 : index
    %c0_46 = arith.constant 0 : index
    %63 = vector.load %arg5[%c0_44, %c3, %c0_45, %c0_46] : memref<1x4x8x8xbf16, #tpu.memory_space<vmem>>, vector<1x1x8x8xbf16>
    %64 = vector.shape_cast %63 : vector<1x1x8x8xbf16> to vector<8x8xbf16>
    %65 = vector.shape_cast %62 : vector<8x8xbf16> to vector<1x1x8x8xbf16>
    tpu.vector_store %arg5[%c0_44, %c3, %c0_45, %c0_46], %65 {strides = array<i32>} : memref<1x4x8x8xbf16, #tpu.memory_space<vmem>>, vector<1x1x8x8xbf16>,
    %66 = vector.extract_strided_slice %7 {offsets = [0, 56], sizes = [8, 8], strides = [1, 1]} : vector<8x96xf32> to vector<8x8xf32>
    %67 = arith.truncf %66 : vector<8x8xf32> to vector<8x8xbf16>
    %c0_47 = arith.constant 0 : index
    %c3_48 = arith.constant 3 : index
    %c0_49 = arith.constant 0 : index
    %c0_50 = arith.constant 0 : index
    %68 = vector.load %arg6[%c0_47, %c3_48, %c0_49, %c0_50] : memref<1x4x8x8xbf16, #tpu.memory_space<vmem>>, vector<1x1x8x8xbf16>
    %69 = vector.shape_cast %68 : vector<1x1x8x8xbf16> to vector<8x8xbf16>
    %70 = vector.shape_cast %67 : vector<8x8xbf16> to vector<1x1x8x8xbf16>
    tpu.vector_store %arg6[%c0_47, %c3_48, %c0_49, %c0_50], %70 {strides = array<i32>} : memref<1x4x8x8xbf16, #tpu.memory_space<vmem>>, vector<1x1x8x8xbf16>,
    %71 = vector.extract_strided_slice %7 {offsets = [0, 88], sizes = [8, 8], strides = [1, 1]} : vector<8x96xf32> to vector<8x8xf32>
    %72 = arith.truncf %71 : vector<8x8xf32> to vector<8x8xbf16>
    %c0_51 = arith.constant 0 : index
    %c3_52 = arith.constant 3 : index
    %c0_53 = arith.constant 0 : index
    %c0_54 = arith.constant 0 : index
    %73 = vector.load %arg7[%c0_51, %c3_52, %c0_53, %c0_54] : memref<1x4x8x8xbf16, #tpu.memory_space<vmem>>, vector<1x1x8x8xbf16>
    %74 = vector.shape_cast %73 : vector<1x1x8x8xbf16> to vector<8x8xbf16>
    %75 = vector.shape_cast %72 : vector<8x8xbf16> to vector<1x1x8x8xbf16>
    tpu.vector_store %arg7[%c0_51, %c3_52, %c0_53, %c0_54], %75 {strides = array<i32>} : memref<1x4x8x8xbf16, #tpu.memory_space<vmem>>, vector<1x1x8x8xbf16>,
    return
  }
  func.func @transform_0(%arg0: i32, %arg1: i32) -> (i32, i32, i32) {
    %c0_i32 = arith.constant 0 : i32
    %c0_i32_0 = arith.constant 0 : i32
    return %arg0, %arg1, %c0_i32 : i32, i32, i32
  }
  func.func @transform_1(%arg0: i32, %arg1: i32) -> (i32, i32) {
    %c0_i32 = arith.constant 0 : i32
    %c0_i32_0 = arith.constant 0 : i32
    %c0_i32_1 = arith.constant 0 : i32
    return %c0_i32, %c0_i32_0 : i32, i32
  }
  func.func @transform_2(%arg0: i32, %arg1: i32) -> (i32, i32) {
    %c0_i32 = arith.constant 0 : i32
    %c0_i32_0 = arith.constant 0 : i32
    %c0_i32_1 = arith.constant 0 : i32
    return %c0_i32, %c0_i32_0 : i32, i32
  }
  func.func @transform_3(%arg0: i32, %arg1: i32) -> (i32, i32, i32, i32) {
    %c0_i32 = arith.constant 0 : i32
    %c0_i32_0 = arith.constant 0 : i32
    %c0_i32_1 = arith.constant 0 : i32
    return %arg0, %c0_i32, %arg1, %c0_i32_0 : i32, i32, i32, i32
  }
  func.func @transform_4(%arg0: i32, %arg1: i32) -> (i32, i32, i32, i32) {
    %c0_i32 = arith.constant 0 : i32
    %c0_i32_0 = arith.constant 0 : i32
    %c0_i32_1 = arith.constant 0 : i32
    return %arg0, %c0_i32, %arg1, %c0_i32_0 : i32, i32, i32, i32
  }
  func.func @transform_5(%arg0: i32, %arg1: i32) -> (i32, i32, i32, i32) {
    %c0_i32 = arith.constant 0 : i32
    %c0_i32_0 = arith.constant 0 : i32
    %c0_i32_1 = arith.constant 0 : i32
    return %arg0, %c0_i32, %arg1, %c0_i32_0 : i32, i32, i32, i32
  }
}

</mosaic_0001>

<bundles_post_ra>
// kernel: tpu_custom_call.1
= control target key start
LH: loop header
LB: loop body
LE: loop exit
PB: predicated region body
PF: predicated region fallthrough
CT: control target
= control target key end

     0   :  { %s1339_s0 = inlined_call_operand.hbm [shape: f32[2,8,32], index: 0, kind: input, shape index: {}]   ;;  %s1340_s1 = inlined_call_operand.hbm [shape: bf16[32,96], index: 1, kind: input, shape index: {}]   ;;  %s1341_s2 = inlined_call_operand.vmem [shape: f32[1,96], index: 2, kind: input, shape index: {}]   ;;  %s1342_s3 = inlined_call_operand.hbm [shape: bf16[2,4,8,8], index: 3, kind: output, shape index: {0}]   ;;  %s1343_s4 = inlined_call_operand.hbm [shape: bf16[2,4,8,8], index: 4, kind: output, shape index: {1}]   ;;  %s1344_s5 = inlined_call_operand.hbm [shape: bf16[2,4,8,8], index: 5, kind: output, shape index: {2}]  }
   0x1   :  { %1348 = sst [smem:[#allocation16_spill]] %s1340_s1 }
   0x2   :  { %11 = vsyncpa [#allocation3], 0 }
   0x3   :  { %13 = vsyncpa [#allocation3 + $0x1], 0 }
   0x4   :  { %14 = vsyncpa [#allocation6], 0 }
   0x5   :  { %15 = vsyncpa [#allocation4], 0 }
   0x6   :  { %17 = vsyncpa [#allocation4 + $0x1], 0 }
   0x7   :  { %18 = vsyncpa [#allocation9], 0 }
   0x8   :  { %20 = vsyncpa [#allocation9 + $0x1], 0  ;;  %s1049_s18 = smov 0   ;;  %s1051_s19 = smov 0  }
   0x9   :  { %s1053_s20 = smov 0   ;;  %s1055_s21 = smov 0  }
   0xa   :  { %s1057_s22 = smov 0   ;;  %s1059_s23 = smov 0  }
   0xb LB: > { %s1080_s24 = sadd.s32 4294967295, %s996_s23   ;;  %s1345_s25 = sadd.s32 4294967294, %s996_s23   ;;  %s996_s23 = sphi %s1059_s23, %s26_s23   ;;  %s992_s22 = sphi %s1057_s22, %s1369_s22   ;;  %s988_s21 = sphi %s1055_s21, %s1368_s21   ;;  %s984_s20 = sphi %s1053_s20, %s1367_s20   ;;  %s980_s19 = sphi %s1051_s19, %s1366_s19   ;;  %s976_s18 = sphi %s1049_s18, %s1365_s18  }
   0xc   : > { %p60_p0 = scmp.ne.s32.totalorder %s980_s19, %s976_s18  ;;  %p1347_p1 = scmp.eq.s32.totalorder %s1080_s24, 0 }
   0xd   : > { %p134_p3 = scmp.eq.s32.totalorder %s1345_s25, 1  ;;  %p648_p5 = scmp.ge.s32.totalorder %s996_s23, 1 }
   0xe   : > { %p1091_p4 = por %p1347_p1, %p60_p0  ;;  %p197_p7 = scmp.lt.s32.totalorder %s996_s23, 3 }
   0xf   : > { %p1096_p6 = por %p134_p3, %p60_p0  ;;  %s998_s29 = smov [#allocation5]  }
  0x10   : > { %p1101_p8 = pnand %p648_p5, %p197_p7  ;;  %s209_s30 = sshll.u32 %s998_s29, 4  ;;  %s210_s30 = int_to_ptr.vmem [resolvable:$true] %s209_s30 }
  0x11   : > { %s1350_s27 = scalar_select %p1096_p6, 1, 0 }
  0x12   : > { %p713_p9 = pneg %p1101_p8  ;;  %s38_s7 = sadd.s32 1, %s992_s22 }
  0x13   : > { %s813_s8 = scalar_lea.vmem %s210_s30, 256  ;;  %p821_p5 = scmp.lt.s32.totalorder %s210_s30, %s210_s30 }
  0x14   : > { %p1110_p11 = pnand %p713_p9, %p1347_p1  ;;  %p814_p13 = scmp.ne.s32.totalorder %s210_s30, %s813_s8 }
  0x15   : > { %p822_p7 = scmp.lt.s32.totalorder %s813_s8, %s813_s8 }
  0x16   : > { %p804_p12 = pneg %p1110_p11 }
  0x17   : > { %p823_p2 = por %p822_p7, %p821_p5 }
  0x18   : > { %p816_p0 = pnand %p814_p13, %p804_p12 }
  0x1a   : > { %p817_p3 = pneg %p816_p0 }
  0x1c   : > { %p824_p6 = pnand %p823_p2, %p817_p3 }
  0x1e   : > { %827 = shalt.err (!%p824_p6)
}
  0x1f   : > { %s999_s9 = smov 64   ;;  %s1000_s10 = smov 4  }
  0x20   : > { %s1353_s1 = sld [smem:[#allocation16_spill]]  ;;  %p40_p2 = scmp.ge.s32.totalorder %s38_s7, 2 }
  0x21   : > { %s47_s13 = sadd.s32 1, %s984_s20  ;;  %p54_p6 = scmp.ne.s32.totalorder %s984_s20, %s980_s19 }
  0x22   : > { %p55_p9 = scmp.eq.s32.totalorder %s996_s23, 0  ;;  %s1371_s7 = smov (%p40_p2, %s38_s7), 0 }
  0x23   : > { %1354 = sst [smem:[#allocation15_spill]] %s1371_s7  ;;  %p1356_p13 = scmp.eq.s32.totalorder %s1080_s24, 1 }
  0x24   : > { %p1128_p12 = por %p55_p9, %p54_p6  ;;  %s42_s16 = ssub.s32 %s992_s22, %s1371_s7 }
  0x25   : > { %p1134_p0 = por %p1356_p13, %p54_p6  ;;  %p732_p3 = scmp.lt.s32.totalorder %s996_s23, 2 }
  0x26   : > { %716 = dma.hbm_to_vmem [thread:$0]  (!%p1110_p11), %s1353_s1, 256, %s210_s30, [#allocation6], %s999_s9, %s999_s9, %s1000_s10  }
  0x27   : > { %p45_p11 = scmp.eq.s32.totalorder %s42_s16, 0  ;;  %s226_s17 = sand.u32 1, %s984_s20  }
  0x28   : > { %s651_s29 = sshll.u32 %s226_s17, 3  ;;  %s652_s6 = sshll.u32 %s992_s22, 7 }
  0x29   : > { %s1143_s30 = scalar_select %p45_p11, %s984_s20, %s47_s13  }
  0x2a   : > { %s236_s10 = scalar_lea.hbm %s1339_s0, %s652_s6  ;;  %s230_s11 = scalar_lea.vmem [#allocation2], %s651_s29 }
  0x2b   : > { %s238_s12 = sshll.u32 %s230_s11, 4  ;;  %p1151_p5 = pnand %p732_p3, %p1128_p12  ;;  %s239_s12 = int_to_ptr.vmem [resolvable:$true] %s238_s12 }
  0x2c   : > { %s227_s1 = scalar_lea.sflag [#allocation3], %s226_s17  ;;  %s841_s16 = scalar_lea.vmem %s239_s12, 128 }
  0x2d   : > { %p830_p7 = pneg %p1151_p5  ;;  %p842_p2 = scmp.ne.s32.totalorder %s239_s12, %s841_s16 }
  0x2e   : > { %s1001_s13 = smov [#allocation2]  }
  0x2f   : > { %p844_p6 = pnand %p842_p2, %p830_p7  ;;  %s846_s7 = sshll.u32 %s1001_s13, 4  ;;  %s847_s7 = int_to_ptr.vmem [resolvable:$false] %s846_s7 }
  0x30   : > { %s848_s6 = scalar_lea.vmem %s847_s7, 256  ;;  %p849_p13 = scmp.lt.s32.totalorder %s239_s12, %s847_s7 }
  0x31   : > { %p845_p9 = pneg %p844_p6  ;;  %p850_p11 = scmp.lt.s32.totalorder %s848_s6, %s841_s16 }
  0x33   : > { %p851_p10 = por %p850_p11, %p849_p13 }
  0x35   : > { %p852_p1 = pnand %p851_p10, %p845_p9 }
  0x37   : > { %855 = shalt.err (!%p852_p1)
}
  0x38   : > { %720 = dma.hbm_to_vmem [thread:$0]  (!%p1151_p5), %s236_s10, 128, %s239_s12, %s227_s1  }
  0x39   : > { %247 = sbr.rel (%p1101_p8) target bundleno = 450 (0x1c2), region = 32  ;;  %s1162_s14 = sand.u32 (!%p1101_p8), 1, %s980_s19  }
  0x3a   : > { %s654_s17 = sshll.u32 (!%p1101_p8), %s1162_s14, 3  ;;  %s250_s29 = scalar_lea.sflag (!%p1101_p8), [#allocation3], %s1162_s14 }
  0x3b   : > { %s253_s8 = scalar_lea.vmem (!%p1101_p8), [#allocation2], %s654_s17 }
  0x3e   : > { %959 = dma.done.wait (%p1091_p4), %s250_s29, 128  }
  0x3f   : > { %961 = vsyncadd (%p1091_p4), %s250_s29, 4294967168  ;;  %p1359_p1 = scmp.eq.s32.totalorder %s1080_s24, 0 }
  0x41   : > { %963 = dma.done.wait (%p1359_p1), [#allocation6], 256   ;;  %p1360_p10 = pmov %p1359_p1 }
  0x42   : > { %v1002_v0 = vmov 0.0   ;;  %vm1003_vm0 = vmmov 0   ;;  %v800_v1 = vld [vmem:[#allocation5 + $0x8] sm:$0xff]   ;;  %v801_v2 = vld [vmem:[#allocation5] sm:$0xff]   ;;  %v295_v3 = vld [vmem:[%s253_s8] sm:$0xff]  ;;  %vm320_vm1 = vcmask 261120  }
  0x43   : > { %965 = vsyncadd (%p1360_p10), [#allocation6], 4294967040  ;;  %693 = vmatprep.subr.bf16.mxu0 %v1002_v0  ;;  %697 = vmatprep.mubr.msk.bf16.mxu0 %vm1003_vm0, %v1002_v0  ;;  %v296_v4 = vpack.c.bf16 %v295_v3, %v295_v3  ;;  %v659_v5 = vld [vmem:[%s1341_s2] ss:$0 sm:$0xff]  ;;  %s1178_s26 = sshll.u32 %s1162_s14, 4  ;;  %vm366_vm2 = vcmask 60416  }
  0x44   : > { %694 = vmatpush3.bf16.msra.mxu0 %v800_v1  ;;  %s1004_s28 = smov 80   ;;  %s1005_s7 = smov 96  }
  0x45   : > { %695 = vmatprep.subr.bf16.mxu0 %v1002_v0  ;;  %s1181_s9 = scalar_lea.vmem [#allocation7], %s1178_s26  ;;  %s1006_s10 = smov 72  }
  0x46   : > { %s1007_s11 = smov 88   ;;  %s1008_s12 = smov 64  }
  0x47   : > { %s1009_s16 = smov 120   ;;  %s1010_s13 = smov 56  }
  0x48   : > { %696 = vmatpush3.bf16.msra.mxu0 %v801_v2  ;;  %s1011_s6 = smov 112   ;;  %s1012_s17 = smov 48  }
  0x49   : > { %s1013_s29 = smov 104   ;;  %s1014_s8 = smov 40  }
  0x4a   : > { %s286_s1 = scalar_lea.vmem [#allocation8], %s1178_s26 }
  0x4b   : > { %698 = vmatmul.mubr.msk.bf16.vlgmr.msra.gmra.mxu0 %vm320_vm1, %v296_v4  ;;  %s470_s25 = sshll.u32 %s286_s1, 4  ;;  %s1193_s25 = int_to_ptr.vmem [resolvable:$true] %s470_s25 }
 0x10b   : > { %v358_v6 = vpop.f32.mrf.mxu0 }
 0x10c   : > { %v359_v7 = vadd.f32 %v659_v5, %v358_v6 }
 0x10d   : > { %v699_v8 = vpop.f32.mrf.mxu0 }
 0x10e   : > { %v364_v9 = vmul.f32 0.35355338, %v359_v7  ;;  %v685_v10 = vpack.c.bf16 %v359_v7, %v359_v7 }
 0x10f   : > { %v361_v11 = vpop.f32.mrf.mxu0 }
 0x110   : > { %v365_v12 = vpack.c.bf16 %v364_v9, %v364_v9  ;;  %403 = vrot.lane.b32.xlu1 %v685_v10, %s1004_s28  ;;  %372 = vrot.lane.b32.xlu0 %v685_v10, %s1005_s7  ;;  %s433_s28 = sand.u32 1, %s1080_s24   ;;  %s1189_s7 = sshll.u32 %s988_s21, 8 }
 0x111   : > { %v700_v13 = vpop.f32.mrf.mxu0  ;;  %s1203_s21 = scalar_lea.sflag [#allocation9], %s433_s28  ;;  %s856_s24 = scalar_lea.vmem %s1193_s25, 256 }
 0x112   : > { %367 = vst.msk [vmem:[%s1181_s9] sm:$0xf] %vm366_vm2, %v365_v12  ;;  %p857_p4 = scmp.ne.s32.totalorder %s1193_s25, %s856_s24 }
 0x114   : > { %418 = vrot.lane.b32.xlu1 %v685_v10, %s1006_s10  ;;  %388 = vrot.lane.b32.xlu0 %v685_v10, %s1007_s11  ;;  %p858_p8 = pnand %p857_p4, %p1134_p0 }
 0x116   : > { %p859_p12 = pneg %p858_p8 }
 0x118   : > { %376 = vrot.lane.b32.xlu0 %v685_v10, %s1008_s12  ;;  %383 = vrot.lane.b32.xlu1 %v365_v12, %s1009_s16  ;;  %s1199_s16 = scalar_lea.hbm %s1343_s4, %s1189_s7 }
 0x11c   : > { %393 = vrot.lane.b32.xlu0 %v685_v10, %s1010_s13  ;;  %398 = vrot.lane.b32.xlu1 %v365_v12, %s1011_s6  ;;  %s1015_s13 = smov [#allocation8]  }
 0x11d   : > { %s860_s6 = sshll.u32 %s1015_s13, 4  ;;  %s861_s6 = int_to_ptr.vmem [resolvable:$false] %s860_s6 }
 0x11e   : > { %p863_p3 = scmp.lt.s32.totalorder %s1193_s25, %s861_s6 }
 0x120   : > { %408 = vrot.lane.b32.xlu0 %v685_v10, %s1012_s17  ;;  %413 = vrot.lane.b32.xlu1 %v365_v12, %s1013_s29  ;;  %s862_s17 = scalar_lea.vmem %s861_s6, 512 }
 0x121   : > { %p864_p5 = scmp.lt.s32.totalorder %s862_s17, %s856_s24 }
 0x123   : > { %p865_p7 = por %p864_p5, %p863_p3 }
 0x124   : > { %423 = vrot.lane.b32.xlu0 %v685_v10, %s1014_s8 }
 0x125   : > { %p866_p2 = pnand %p865_p7, %p859_p12 }
 0x182   : > { %v404_v14 = vpop.permute.xlu1 %403  ;;  %v373_v15 = vpop.permute.xlu0 %372 }
 0x183   : > { %669 = vst.msk [vmem:[%s286_s1 + $0x8] sm:$0xf] %vm366_vm2, %v404_v14  ;;  %375 = vst.msk [vmem:[%s286_s1] sm:$0xf] %vm366_vm2, %v373_v15 }
 0x186   : > { %v419_v16 = vpop.permute.xlu1 %418  ;;  %v389_v17 = vpop.permute.xlu0 %388 }
 0x187   : > { %672 = vst.msk [vmem:[%s286_s1 + $0xc] sm:$0xf] %vm366_vm2, %v419_v16  ;;  %666 = vst.msk [vmem:[%s286_s1 + $0x4] sm:$0xf] %vm366_vm2, %v389_v17 }
 0x188   : > { %869 = shalt.err (!%p866_p2)
}
 0x189   : > { %s870_s29 = scalar_lea.hbm %s1199_s16, 256  ;;  %s874_s28 = scalar_lea.hbm %s1343_s4, 512 }
 0x18a   : > { %p871_p6 = scmp.ne.s32.totalorder %s1199_s16, %s870_s29  ;;  %p875_p11 = scmp.lt.s32.totalorder %s1199_s16, %s1343_s4 }
 0x18b   : > { %p876_p1 = scmp.lt.s32.totalorder %s874_s28, %s870_s29 }
 0x18c   : > { %p872_p9 = pnand %p871_p6, %p1134_p0 }
 0x18d   : > { %p877_p10 = por %p876_p1, %p875_p11 }
 0x18e   : > { %p873_p13 = pneg %p872_p9 }
 0x190   : > { %p878_p4 = pnand %p877_p10, %p873_p13 }
 0x192   : > { %881 = shalt.err (!%p878_p4)
}
 0x193   : > { %s1016_s24 = smov 4   ;;  %v377_v18 = vpop.permute.xlu0 %376  ;;  %v384_v19 = vpop.permute.xlu1 %383  ;;  %s1230_s13 = scalar_lea.vmem [#allocation10], %s1178_s26 }
 0x194   : > { %708 = dma.vmem_to_hbm [thread:$0]  (%p1134_p0), %s1193_s25, 256, %s1199_s16, %s1203_s21, %s1008_s12, %s1008_s12, %s1016_s24  }
 0x195   : > { %379 = vst.msk [vmem:[%s1230_s13] sm:$0xf] %vm366_vm2, %v377_v18  ;;  %665 = vst.msk [vmem:[%s1181_s9 + $0x4] sm:$0xf] %vm366_vm2, %v384_v19  ;;  %s453_s6 = sshll.u32 %s1181_s9, 4  ;;  %s1247_s16 = scalar_lea.hbm %s1342_s3, %s1189_s7  ;;  %s1241_s6 = int_to_ptr.vmem [resolvable:$true] %s453_s6 }
 0x196   : > { %s487_s17 = sshll.u32 %s1230_s13, 4  ;;  %s429_s29 = scalar_lea.sflag [#allocation4], %s1162_s14  ;;  %s1280_s17 = int_to_ptr.vmem [resolvable:$true] %s487_s17 }
 0x197   : > { %v394_v20 = vpop.permute.xlu0 %393  ;;  %v399_v21 = vpop.permute.xlu1 %398  ;;  %s882_s8 = scalar_lea.vmem %s1241_s6, 256  ;;  %s1017_s1 = smov [#allocation7]  }
 0x198   : > { %667 = vst.msk [vmem:[%s1230_s13 + $0x4] sm:$0xf] %vm366_vm2, %v394_v20  ;;  %668 = vst.msk [vmem:[%s1181_s9 + $0x8] sm:$0xf] %vm366_vm2, %v399_v21  ;;  %p883_p8 = scmp.ne.s32.totalorder %s1241_s6, %s882_s8  ;;  %s886_s28 = sshll.u32 %s1017_s1, 4  ;;  %s887_s28 = int_to_ptr.vmem [resolvable:$false] %s886_s28 }
 0x199   : > { %s888_s10 = scalar_lea.vmem %s887_s28, 512  ;;  %p889_p5 = scmp.lt.s32.totalorder %s1241_s6, %s887_s28 }
 0x19a   : > { %p884_p12 = pnand %p883_p8, %p1134_p0  ;;  %p890_p7 = scmp.lt.s32.totalorder %s888_s10, %s882_s8 }
 0x19b   : > { %v409_v22 = vpop.permute.xlu0 %408  ;;  %v414_v23 = vpop.permute.xlu1 %413 }
 0x19c   : > { %670 = vst.msk [vmem:[%s1230_s13 + $0x8] sm:$0xf] %vm366_vm2, %v409_v22  ;;  %671 = vst.msk [vmem:[%s1181_s9 + $0xc] sm:$0xf] %vm366_vm2, %v414_v23  ;;  %p885_p3 = pneg %p884_p12  ;;  %p891_p2 = por %p890_p7, %p889_p5 }
 0x19e   : > { %p892_p6 = pnand %p891_p2, %p885_p3 }
 0x1a0   : > { %895 = shalt.err (!%p892_p6)
}
 0x1a1   : > { %s896_s9 = scalar_lea.hbm %s1247_s16, 256  ;;  %s900_s26 = scalar_lea.hbm %s1342_s3, 512 }
 0x1a2   : > { %p897_p9 = scmp.ne.s32.totalorder %s1247_s16, %s896_s9  ;;  %p901_p1 = scmp.lt.s32.totalorder %s1247_s16, %s1342_s3 }
 0x1a3   : > { %p902_p10 = scmp.lt.s32.totalorder %s900_s26, %s896_s9 }
 0x1a4   : > { %p898_p13 = pnand %p897_p9, %p1134_p0 }
 0x1a5   : > { %p903_p4 = por %p902_p10, %p901_p1 }
 0x1a6   : > { %p899_p11 = pneg %p898_p13 }
 0x1a8   : > { %p904_p8 = pnand %p903_p4, %p899_p11 }
 0x1aa   : > { %907 = shalt.err (!%p904_p8)
}
 0x1ab   : > { %707 = dma.vmem_to_hbm [thread:$0]  (%p1134_p0), %s1241_s6, 256, %s1247_s16, %s429_s29, %s1008_s12, %s1008_s12, %s1016_s24   ;;  %v424_v24 = vpop.permute.xlu0 %423 }
 0x1ac   : > { %s1286_s10 = scalar_lea.hbm %s1344_s5, %s1189_s7  ;;  %673 = vst.msk [vmem:[%s1230_s13 + $0xc] sm:$0xf] %vm366_vm2, %v424_v24  ;;  %s908_s9 = scalar_lea.vmem %s1280_s17, 256 }
 0x1ad   : > { %p909_p12 = scmp.ne.s32.totalorder %s1280_s17, %s908_s9  ;;  %s1018_s6 = smov [#allocation10]  }
 0x1ae   : > { %s912_s16 = sshll.u32 %s1018_s6, 4  ;;  %s913_s16 = int_to_ptr.vmem [resolvable:$false] %s912_s16 }
 0x1af   : > { %p910_p3 = pnand %p909_p12, %p1134_p0  ;;  %s914_s29 = scalar_lea.vmem %s913_s16, 512 }
 0x1b0   : > { %p915_p7 = scmp.lt.s32.totalorder %s1280_s17, %s913_s16  ;;  %p916_p2 = scmp.lt.s32.totalorder %s914_s29, %s908_s9 }
 0x1b1   : > { %p911_p5 = pneg %p910_p3 }
 0x1b2   : > { %p917_p6 = por %p916_p2, %p915_p7 }
 0x1b4   : > { %p918_p9 = pnand %p917_p6, %p911_p5 }
 0x1b6   : > { %921 = shalt.err (!%p918_p9)
}
 0x1b7   : > { %s922_s7 = scalar_lea.hbm %s1286_s10, 256  ;;  %s926_s11 = scalar_lea.hbm %s1344_s5, 512 }
 0x1b8   : > { %p923_p13 = scmp.ne.s32.totalorder %s1286_s10, %s922_s7  ;;  %p927_p10 = scmp.lt.s32.totalorder %s1286_s10, %s1344_s5 }
 0x1b9   : > { %p928_p4 = scmp.lt.s32.totalorder %s926_s11, %s922_s7 }
 0x1ba   : > { %p924_p11 = pnand %p923_p13, %p1134_p0 }
 0x1bb   : > { %p929_p8 = por %p928_p4, %p927_p10 }
 0x1bc   : > { %p925_p1 = pneg %p924_p11 }
 0x1be   : > { %p930_p12 = pnand %p929_p8, %p925_p1 }
 0x1c0   : > { %933 = shalt.err (!%p930_p12)
}
 0x1c1   : > { %709 = dma.vmem_to_hbm [thread:$0]  (%p1134_p0), %s1280_s17, 256, %s1286_s10, %s1203_s21, %s1008_s12, %s1008_s12, %s1016_s24  }
 0x1c2 PF: > { %s502_s1 = sand.u32 1, %s976_s18   ;;  %p1361_p3 = scmp.ne.s32.totalorder %s1350_s27, 0 }
 0x1c3   : > { %p1362_p5 = scmp.ge.s32.totalorder %s996_s23, 2  ;;  %s503_s8 = scalar_lea.sflag [#allocation4], %s502_s1 }
 0x1c5   : > { %p722_p7 = pnand %p1362_p5, %p1361_p3 }
 0x1c7   : > { %p723_p2 = pneg %p722_p7 }
 0x1c9   : > { %967 = dma.done.wait (%p723_p2), %s503_s8, 256  }
 0x1ca   : > { %969 = vsyncadd (%p723_p2), %s503_s8, 4294967040  ;;  %s1363_s15 = sadd.s32 4294967294, %s996_s23  }
 0x1cb   : > { %s511_s28 = sand.u32 1, %s1363_s15  }
 0x1cc   : > { %s512_s9 = scalar_lea.sflag [#allocation9], %s511_s28 }
 0x1cd   : > { %971 = dma.done.wait (%p723_p2), %s512_s9, 512  }
 0x1ce   : > { %973 = vsyncadd (%p723_p2), %s512_s9, 4294966784  ;;  %s26_s23 = sadd.s32 1, %s996_s23   ;;  %s1364_s27 = sld [smem:[#allocation15_spill]] }
 0x1cf   : > { %p23_p0 = scmp.ge.s32.totalorder %s26_s23, 4   ;;  %s1365_s18 = smov %s980_s19 }
 0x1d0   : > { %s1366_s19 = smov %s984_s20  ;;  %s1367_s20 = smov %s1143_s30 }
 0x1d1   : > { %s1368_s21 = smov %s992_s22  ;;  %25 = sbr.rel (!%p23_p0) target bundleno = 11 (0xb), region = 122 }
 0x1d4   : > { %s1369_s22 = smov %s1364_s27 }
 0x1d6   :  { %526 = vsyncpa [#allocation3], 1 }
 0x1d7   :  { %528 = vsyncpa [#allocation3 + $0x1], 1 }
 0x1d8   :  { %529 = vsyncpa [#allocation6], 1 }
 0x1d9   :  { %530 = vsyncpa [#allocation4], 1 }
 0x1da   :  { %532 = vsyncpa [#allocation4 + $0x1], 1 }
 0x1db   :  { %533 = vsyncpa [#allocation9], 1 }
 0x1dc   :  { %535 = vsyncpa [#allocation9 + $0x1], 1 }

</bundles_post_ra>
